<compile_context>
chip_gen: v5e
topology: v5e:2x2
jax: 0.10.0
libtpu: 0.0.40
codegen_flags: <defaults>
</compile_context>

<pallas_src>
import functools

import jax
import jax.numpy as jnp
from jax.experimental import pallas as pl
from jax.experimental.pallas import tpu as pltpu

STATE_DIM = 12
ACTION_DIM = 4
HIDDEN = 256


def _round_up(x, m):
    return ((x + m - 1) // m) * m


def _critic_kernel(
    sa_ref,                             # (TB, S+A)  f32 input
    w1_ref, b1_ref,                     # (S+A, 2H) bf16, (1, 2H) f32  fused heads
    w21_ref, b21_ref,                   # (H, H) bf16, (1, H) f32      head q1 layer 2
    w22_ref, b22_ref,                   # (H, H) bf16, (1, H) f32      head q2 layer 2
    w3_ref,                             # (2, H) f32  rows = (q1 w3^T, q2 w3^T)
    b3_ref,                             # SMEM (2,) f32 = (q1 b3, q2 b3)
    q_ref,                              # (TB, 2) f32 packed output
):
    h = w21_ref.shape[0]                # hidden size (256)
    tb = q_ref.shape[0]

    # Layer 1, both heads fused in one MXU matmul; bf16 operands, f32 acc.
    sa = sa_ref[...].astype(jnp.bfloat16)
    h1 = (jnp.dot(sa, w1_ref[...], preferred_element_type=jnp.float32)
          + b1_ref[...])
    h1 = jnp.maximum(h1, 0.0)

    # Static, 128-aligned lane slices: columns [0:H) = head q1, [H:2H) = q2.
    h1_q1 = h1[:, :h].astype(jnp.bfloat16)
    h1_q2 = h1[:, h:].astype(jnp.bfloat16)

    h2_q1 = jnp.maximum(
        jnp.dot(h1_q1, w21_ref[...], preferred_element_type=jnp.float32)
        + b21_ref[...], 0.0)
    h2_q2 = jnp.maximum(
        jnp.dot(h1_q2, w22_ref[...], preferred_element_type=jnp.float32)
        + b22_ref[...], 0.0)

    # Layer 3 (out_features = 1): VPU multiply + lane reduction (XLU), all in
    # f32 (not a dot operand -> no bf16 cast); biases from SMEM scalars.
    w3 = w3_ref[...]                                            # (2, H) f32
    q1 = jnp.sum(h2_q1 * w3[0:1, :], axis=-1, keepdims=True) + b3_ref[0]
    q2 = jnp.sum(h2_q2 * w3[1:2, :], axis=-1, keepdims=True) + b3_ref[1]

    # Pack both heads into the (TB, 2) output without unaligned lane concat:
    # column-select via iota + where (pure VPU broadcast/select).
    col = jax.lax.broadcasted_iota(jnp.int32, (tb, 2), 1)
    q_ref[...] = jnp.where(col == 0, q1, q2)


def init_params(key, state_dim=STATE_DIM, action_dim=ACTION_DIM, hidden=HIDDEN):
    """PyTorch-style uniform(+-1/sqrt(fan_in)) init, per head.

    Weights stored [in, out] (transpose of nn.Linear.weight), biases [1, out].
    Order: (w1, b1, w2, b2, w3, b3) for q1 then the same for q2.  f32.
    """
    in_dim = state_dim + action_dim
    dims = [(in_dim, hidden), (hidden, hidden), (hidden, 1)]
    params = []
    for _head in range(2):
        for fan_in, fan_out in dims:
            key, kw, kb = jax.random.split(key, 3)
            bound = 1.0 / float(fan_in) ** 0.5
            params.append(
                jax.random.uniform(kw, (fan_in, fan_out), jnp.float32, -bound, bound))
            params.append(
                jax.random.uniform(kb, (1, fan_out), jnp.float32, -bound, bound))
    return tuple(params)


def pack_params(params):
    """One-time repack of per-head f32 params into the fused kernel layout.

    MXU (dot) operands -> bf16; everything else (biases, w3 vectors) -> f32.
    """
    (w1a, b1a, w2a, b2a, w3a, b3a,
     w1b, b1b, w2b, b2b, w3b, b3b) = params
    w1 = jnp.concatenate([w1a, w1b], axis=1).astype(jnp.bfloat16)   # [S+A, 2H]
    b1 = jnp.concatenate([b1a, b1b], axis=1)                        # [1, 2H] f32
    w21 = w2a.astype(jnp.bfloat16)                                  # [H, H]
    w22 = w2b.astype(jnp.bfloat16)                                  # [H, H]
    w3 = jnp.concatenate([w3a.T, w3b.T], axis=0)                    # [2, H] f32
    b3 = jnp.concatenate([b3a.reshape(1), b3b.reshape(1)])          # [2] f32 (SMEM)
    return (w1, b1, w21, b2a, w22, b2b, w3, b3)


@functools.partial(jax.jit, static_argnames=("block_batch",))
def simple_critic_forward(state, action, packed, *, block_batch=512):
    """Mirrors SimpleCritic.forward: returns (q1, q2), each [B, 1]."""
    batch = state.shape[0]
    (w1, b1, w21, b21, w22, b22, w3, b3) = packed
    sa_dim = w1.shape[0]
    hidden2 = b1.shape[1]
    hidden = hidden2 // 2

    # One fused layer-1 input: concat is only (S+A)*4 = 64 B/row on the host
    # side and lets layer 1 run as a single MXU K-pass.
    sa = jnp.concatenate([state, action], axis=1)

    # Batch tile selection:
    #  * tiny batches -> single full-batch tile (block == full dim is legal).
    #  * otherwise a multiple-of-8 tile; aim for grid >= 2 so v7x's two
    #    TensorCores both get work under dimension_semantics=("parallel",).
    block_batch = max(8, _round_up(block_batch, 8))
    if batch <= 16:
        tb = batch
    else:
        tb = min(block_batch, max(8, _round_up(pl.cdiv(batch, 2), 8)))
    grid = (pl.cdiv(batch, tb),)

    batch_map = lambda i: (i, 0)   # tiles along batch
    const_map = lambda i: (0, 0)   # weights resident across grid steps

    in_specs = [
        pl.BlockSpec((tb, sa_dim), batch_map),
        pl.BlockSpec(w1.shape, const_map),
        pl.BlockSpec(b1.shape, const_map),
        pl.BlockSpec(w21.shape, const_map),
        pl.BlockSpec(b21.shape, const_map),
        pl.BlockSpec(w22.shape, const_map),
        pl.BlockSpec(b22.shape, const_map),
        pl.BlockSpec(w3.shape, const_map),
        pl.BlockSpec(memory_space=pltpu.MemorySpace.SMEM),   # b3 scalars
    ]
    out_specs = pl.BlockSpec((tb, 2), batch_map)

    param_bytes = sum(p.size * p.dtype.itemsize for p in packed)
    flops = 2 * batch * (sa_dim * hidden2 + 2 * hidden * hidden + 2 * hidden)
    bytes_accessed = param_bytes + batch * (sa_dim + 2) * 4

    q = pl.pallas_call(
        _critic_kernel,
        grid=grid,
        out_shape=jax.ShapeDtypeStruct((batch, 2), jnp.float32),
        in_specs=in_specs,
        out_specs=out_specs,
        compiler_params=pltpu.CompilerParams(
            dimension_semantics=("parallel",),
            vmem_limit_bytes=32 * 1024 * 1024,
        ),
        cost_estimate=pl.CostEstimate(
            flops=flops, transcendentals=0, bytes_accessed=bytes_accessed),
    )(sa, w1, b1, w21, b21, w22, b22, w3, b3)

    return q[:, 0:1], q[:, 1:2]


def _reference_forward(state, action, params):
    """Pure-JAX f32 reference (mirrors the PyTorch module) for correctness."""
    sa = jnp.concatenate([state, action], axis=1)
    (w1a, b1a, w2a, b2a, w3a, b3a,
     w1b, b1b, w2b, b2b, w3b, b3b) = params

    def mlp(x, w1, b1, w2, b2, w3, b3):
        h1 = jnp.maximum(x @ w1 + b1, 0.0)
        h2 = jnp.maximum(h1 @ w2 + b2, 0.0)
        return h2 @ w3 + b3

    return (mlp(sa, w1a, b1a, w2a, b2a, w3a, b3a),
            mlp(sa, w1b, b1b, w2b, b2b, w3b, b3b))


if __name__ == "__main__":
    key = jax.random.PRNGKey(0)
    kp, ks, ka = jax.random.split(key, 3)

    params = init_params(kp)
    packed = pack_params(params)

    # Tolerance reflects bf16 MXU operands (f32 accumulation) vs f32 reference.
    ATOL = RTOL = 2e-2

    # Small single-tile case.
    batch = 8
    state = jax.random.normal(ks, (batch, STATE_DIM), jnp.float32)
    action = jax.random.normal(ka, (batch, ACTION_DIM), jnp.float32)
    q1, q2 = simple_critic_forward(state, action, packed)
    jax.block_until_ready((q1, q2))

    r1, r2 = _reference_forward(state, action, params)
    assert q1.shape == (batch, 1) and q2.shape == (batch, 1)
    assert jnp.allclose(q1, r1, atol=ATOL, rtol=RTOL)
    assert jnp.allclose(q2, r2, atol=ATOL, rtol=RTOL)

    # Multi-step grid case (3 batch tiles, weights resident across steps,
    # exercises the partial-final-tile path via Pallas OOB padding).
    batch2 = 24
    ks2, ka2 = jax.random.split(jax.random.PRNGKey(1))
    state2 = jax.random.normal(ks2, (batch2, STATE_DIM), jnp.float32)
    action2 = jax.random.normal(ka2, (batch2, ACTION_DIM), jnp.float32)
    q1b, q2b = simple_critic_forward(state2, action2, packed, block_batch=8)
    jax.block_until_ready((q1b, q2b))

    r1b, r2b = _reference_forward(state2, action2, params)
    assert jnp.allclose(q1b, r1b, atol=ATOL, rtol=RTOL)
    assert jnp.allclose(q2b, r2b, atol=ATOL, rtol=RTOL)

    # Larger batch: tile auto-splits to keep grid >= 2 (v7x both-TC path).
    batch3 = 40
    ks3, ka3 = jax.random.split(jax.random.PRNGKey(2))
    state3 = jax.random.normal(ks3, (batch3, STATE_DIM), jnp.float32)
    action3 = jax.random.normal(ka3, (batch3, ACTION_DIM), jnp.float32)
    q1c, q2c = simple_critic_forward(state3, action3, packed)
    jax.block_until_ready((q1c, q2c))

    r1c, r2c = _reference_forward(state3, action3, params)
    assert jnp.allclose(q1c, r1c, atol=ATOL, rtol=RTOL)
    assert jnp.allclose(q2c, r2c, atol=ATOL, rtol=RTOL)

    print("KERNEL_OK")
</pallas_src>

<mosaic_0001>
module attributes {stable_mosaic.version = 11 : i64} {
  func.func @_critic_kernel(%arg0: i32, %arg1: memref<8x16xf32, #tpu.memory_space<vmem>>, %arg2: memref<16x512xbf16, #tpu.memory_space<vmem>>, %arg3: memref<1x512xf32, #tpu.memory_space<vmem>>, %arg4: memref<256x256xbf16, #tpu.memory_space<vmem>>, %arg5: memref<1x256xf32, #tpu.memory_space<vmem>>, %arg6: memref<256x256xbf16, #tpu.memory_space<vmem>>, %arg7: memref<1x256xf32, #tpu.memory_space<vmem>>, %arg8: memref<2x256xf32, #tpu.memory_space<vmem>>, %arg9: memref<2xf32, #tpu.memory_space<smem>>, %arg10: memref<8x2xf32, #tpu.memory_space<vmem>>) attributes {dimension_semantics = [#tpu.dimension_semantics<parallel>], iteration_bounds = array<i64: 1>, scalar_prefetch = 0 : i64, scratch_operands = 0 : i64, tpu.core_type = #tpu.core_type<tc>, window_params = [{transform_indices = @transform_0, window_bounds = array<i64: 8, 16>}, {pipeline_mode = #tpu.pipeline_mode<synchronous>, transform_indices = @transform_1, window_bounds = array<i64: 16, 512>}, {pipeline_mode = #tpu.pipeline_mode<synchronous>, transform_indices = @transform_2, window_bounds = array<i64: 1, 512>}, {pipeline_mode = #tpu.pipeline_mode<synchronous>, transform_indices = @transform_3, window_bounds = array<i64: 256, 256>}, {pipeline_mode = #tpu.pipeline_mode<synchronous>, transform_indices = @transform_4, window_bounds = array<i64: 1, 256>}, {pipeline_mode = #tpu.pipeline_mode<synchronous>, transform_indices = @transform_5, window_bounds = array<i64: 256, 256>}, {pipeline_mode = #tpu.pipeline_mode<synchronous>, transform_indices = @transform_6, window_bounds = array<i64: 1, 256>}, {pipeline_mode = #tpu.pipeline_mode<synchronous>, transform_indices = @transform_7, window_bounds = array<i64: 2, 256>}, {transform_indices = @transform_8, window_bounds = array<i64: 2>}, {transform_indices = @transform_9, window_bounds = array<i64: 8, 2>}]} {
    %c0 = arith.constant 0 : index
    %c0_0 = arith.constant 0 : index
    %0 = vector.load %arg1[%c0, %c0_0] : memref<8x16xf32, #tpu.memory_space<vmem>>, vector<8x16xf32>
    %1 = arith.truncf %0 : vector<8x16xf32> to vector<8x16xbf16>
    %c0_1 = arith.constant 0 : index
    %c0_2 = arith.constant 0 : index
    %2 = vector.load %arg2[%c0_1, %c0_2] : memref<16x512xbf16, #tpu.memory_space<vmem>>, vector<16x512xbf16>
    %cst = arith.constant dense<0.000000e+00> : vector<8x512xf32>
    %3 = tpu.matmul %1, %2, %cst {dimension_numbers = #tpu.dot_dimension_numbers<[1], [0], [0], [1], [0, 0, 1, 1], [], []>} : vector<8x16xbf16>, vector<16x512xbf16>, vector<8x512xf32> -> vector<8x512xf32>
    %c0_3 = arith.constant 0 : index
    %c0_4 = arith.constant 0 : index
    %4 = vector.load %arg3[%c0_3, %c0_4] : memref<1x512xf32, #tpu.memory_space<vmem>>, vector<1x512xf32>
    %5 = vector.broadcast %4 : vector<1x512xf32> to vector<8x512xf32>
    %6 = arith.addf %3, %5 : vector<8x512xf32>
    %cst_5 = arith.constant 0.000000e+00 : f32
    %7 = vector.broadcast %cst_5 : f32 to vector<8x512xf32>
    %8 = arith.maximumf %6, %7 : vector<8x512xf32>
    %9 = vector.extract_strided_slice %8 {offsets = [0, 0], sizes = [8, 256], strides = [1, 1]} : vector<8x512xf32> to vector<8x256xf32>
    %10 = arith.truncf %9 : vector<8x256xf32> to vector<8x256xbf16>
    %11 = vector.extract_strided_slice %8 {offsets = [0, 256], sizes = [8, 256], strides = [1, 1]} : vector<8x512xf32> to vector<8x256xf32>
    %12 = arith.truncf %11 : vector<8x256xf32> to vector<8x256xbf16>
    %c0_6 = arith.constant 0 : index
    %c0_7 = arith.constant 0 : index
    %13 = vector.load %arg4[%c0_6, %c0_7] : memref<256x256xbf16, #tpu.memory_space<vmem>>, vector<256x256xbf16>
    %cst_8 = arith.constant dense<0.000000e+00> : vector<8x256xf32>
    %14 = tpu.matmul %10, %13, %cst_8 {dimension_numbers = #tpu.dot_dimension_numbers<[1], [0], [0], [1], [0, 0, 1, 1], [], []>} : vector<8x256xbf16>, vector<256x256xbf16>, vector<8x256xf32> -> vector<8x256xf32>
    %c0_9 = arith.constant 0 : index
    %c0_10 = arith.constant 0 : index
    %15 = vector.load %arg5[%c0_9, %c0_10] : memref<1x256xf32, #tpu.memory_space<vmem>>, vector<1x256xf32>
    %16 = vector.broadcast %15 : vector<1x256xf32> to vector<8x256xf32>
    %17 = arith.addf %14, %16 : vector<8x256xf32>
    %cst_11 = arith.constant 0.000000e+00 : f32
    %18 = vector.broadcast %cst_11 : f32 to vector<8x256xf32>
    %19 = arith.maximumf %17, %18 : vector<8x256xf32>
    %c0_12 = arith.constant 0 : index
    %c0_13 = arith.constant 0 : index
    %20 = vector.load %arg6[%c0_12, %c0_13] : memref<256x256xbf16, #tpu.memory_space<vmem>>, vector<256x256xbf16>
    %cst_14 = arith.constant dense<0.000000e+00> : vector<8x256xf32>
    %21 = tpu.matmul %12, %20, %cst_14 {dimension_numbers = #tpu.dot_dimension_numbers<[1], [0], [0], [1], [0, 0, 1, 1], [], []>} : vector<8x256xbf16>, vector<256x256xbf16>, vector<8x256xf32> -> vector<8x256xf32>
    %c0_15 = arith.constant 0 : index
    %c0_16 = arith.constant 0 : index
    %22 = vector.load %arg7[%c0_15, %c0_16] : memref<1x256xf32, #tpu.memory_space<vmem>>, vector<1x256xf32>
    %23 = vector.broadcast %22 : vector<1x256xf32> to vector<8x256xf32>
    %24 = arith.addf %21, %23 : vector<8x256xf32>
    %cst_17 = arith.constant 0.000000e+00 : f32
    %25 = vector.broadcast %cst_17 : f32 to vector<8x256xf32>
    %26 = arith.maximumf %24, %25 : vector<8x256xf32>
    %c0_18 = arith.constant 0 : index
    %c0_19 = arith.constant 0 : index
    %27 = vector.load %arg8[%c0_18, %c0_19] : memref<2x256xf32, #tpu.memory_space<vmem>>, vector<2x256xf32>
    %28 = vector.extract_strided_slice %27 {offsets = [0, 0], sizes = [1, 256], strides = [1, 1]} : vector<2x256xf32> to vector<1x256xf32>
    %29 = vector.broadcast %28 : vector<1x256xf32> to vector<8x256xf32>
    %30 = arith.mulf %19, %29 : vector<8x256xf32>
    %cst_20 = arith.constant dense<0.000000e+00> : vector<8xf32>
    %31 = vector.multi_reduction <add>, %30, %cst_20 [1] : vector<8x256xf32> to vector<8xf32>
    %32 = vector.shape_cast %31 : vector<8xf32> to vector<8x1xf32>
    %c0_21 = arith.constant 0 : index
    %33 = memref.load %arg9[%c0_21] : memref<2xf32, #tpu.memory_space<smem>>
    %34 = vector.broadcast %33 : f32 to vector<8x1xf32>
    %35 = arith.addf %32, %34 : vector<8x1xf32>
    %36 = vector.extract_strided_slice %27 {offsets = [1, 0], sizes = [1, 256], strides = [1, 1]} : vector<2x256xf32> to vector<1x256xf32>
    %37 = vector.broadcast %36 : vector<1x256xf32> to vector<8x256xf32>
    %38 = arith.mulf %26, %37 : vector<8x256xf32>
    %cst_22 = arith.constant dense<0.000000e+00> : vector<8xf32>
    %39 = vector.multi_reduction <add>, %38, %cst_22 [1] : vector<8x256xf32> to vector<8xf32>
    %40 = vector.shape_cast %39 : vector<8xf32> to vector<8x1xf32>
    %c1 = arith.constant 1 : index
    %41 = memref.load %arg9[%c1] : memref<2xf32, #tpu.memory_space<smem>>
    %42 = vector.broadcast %41 : f32 to vector<8x1xf32>
    %43 = arith.addf %40, %42 : vector<8x1xf32>
    %44 = tpu.iota {dimensions = array<i32: 1>} : vector<8x2xi32>
    %c0_i32 = arith.constant 0 : i32
    %45 = vector.broadcast %c0_i32 : i32 to vector<8x2xi32>
    %46 = arith.cmpi eq, %44, %45 : vector<8x2xi32>
    %47 = vector.shape_cast %35 : vector<8x1xf32> to vector<8x1xf32>
    %48 = vector.broadcast %47 : vector<8x1xf32> to vector<8x2xf32>
    %49 = vector.shape_cast %43 : vector<8x1xf32> to vector<8x1xf32>
    %50 = vector.broadcast %49 : vector<8x1xf32> to vector<8x2xf32>
    %51 = arith.select %46, %48, %50 : vector<8x2xi1>, vector<8x2xf32>
    %c0_23 = arith.constant 0 : index
    %c0_24 = arith.constant 0 : index
    %52 = vector.load %arg10[%c0_23, %c0_24] : memref<8x2xf32, #tpu.memory_space<vmem>>, vector<8x2xf32>
    tpu.vector_store %arg10[%c0_23, %c0_24], %51 {strides = array<i32>} : memref<8x2xf32, #tpu.memory_space<vmem>>, vector<8x2xf32>,
    return
  }
  func.func @transform_0(%arg0: i32) -> (i32, i32) {
    %c0_i32 = arith.constant 0 : i32
    %c0_i32_0 = arith.constant 0 : i32
    return %arg0, %c0_i32 : i32, i32
  }
  func.func @transform_1(%arg0: i32) -> (i32, i32) {
    %c0_i32 = arith.constant 0 : i32
    %c0_i32_0 = arith.constant 0 : i32
    %c0_i32_1 = arith.constant 0 : i32
    return %c0_i32, %c0_i32_0 : i32, i32
  }
  func.func @transform_2(%arg0: i32) -> (i32, i32) {
    %c0_i32 = arith.constant 0 : i32
    %c0_i32_0 = arith.constant 0 : i32
    %c0_i32_1 = arith.constant 0 : i32
    return %c0_i32, %c0_i32_0 : i32, i32
  }
  func.func @transform_3(%arg0: i32) -> (i32, i32) {
    %c0_i32 = arith.constant 0 : i32
    %c0_i32_0 = arith.constant 0 : i32
    %c0_i32_1 = arith.constant 0 : i32
    return %c0_i32, %c0_i32_0 : i32, i32
  }
  func.func @transform_4(%arg0: i32) -> (i32, i32) {
    %c0_i32 = arith.constant 0 : i32
    %c0_i32_0 = arith.constant 0 : i32
    %c0_i32_1 = arith.constant 0 : i32
    return %c0_i32, %c0_i32_0 : i32, i32
  }
  func.func @transform_5(%arg0: i32) -> (i32, i32) {
    %c0_i32 = arith.constant 0 : i32
    %c0_i32_0 = arith.constant 0 : i32
    %c0_i32_1 = arith.constant 0 : i32
    return %c0_i32, %c0_i32_0 : i32, i32
  }
  func.func @transform_6(%arg0: i32) -> (i32, i32) {
    %c0_i32 = arith.constant 0 : i32
    %c0_i32_0 = arith.constant 0 : i32
    %c0_i32_1 = arith.constant 0 : i32
    return %c0_i32, %c0_i32_0 : i32, i32
  }
  func.func @transform_7(%arg0: i32) -> (i32, i32) {
    %c0_i32 = arith.constant 0 : i32
    %c0_i32_0 = arith.constant 0 : i32
    %c0_i32_1 = arith.constant 0 : i32
    return %c0_i32, %c0_i32_0 : i32, i32
  }
  func.func @transform_8(%arg0: i32) -> i32 {
    %c0_i32 = arith.constant 0 : i32
    %c0_i32_0 = arith.constant 0 : i32
    return %c0_i32 : i32
  }
  func.func @transform_9(%arg0: i32) -> (i32, i32) {
    %c0_i32 = arith.constant 0 : i32
    %c0_i32_0 = arith.constant 0 : i32
    return %arg0, %c0_i32 : i32, i32
  }
}

</mosaic_0001>

<bundles_post_ra>
// kernel: simple_critic_forward.1
= control target key start
LH: loop header
LB: loop body
LE: loop exit
PB: predicated region body
PF: predicated region fallthrough
CT: control target
= control target key end

     0   :  { %14 = vsyncpa [#allocation3], 0  ;;  %s1290_s0 = inlined_call_operand.vmem [shape: f32[8,16], index: 0, kind: input, shape index: {}]   ;;  %s1291_s1 = inlined_call_operand.vmem [shape: bf16[16,512], index: 1, kind: input, shape index: {}]   ;;  %s1292_s2 = inlined_call_operand.vmem [shape: f32[1,512], index: 2, kind: input, shape index: {}]   ;;  %s1293_s3 = inlined_call_operand.hbm [shape: bf16[256,256], index: 3, kind: input, shape index: {}]   ;;  %s1294_s4 = inlined_call_operand.hbm [shape: f32[1,256], index: 4, kind: input, shape index: {}]   ;;  %s1295_s5 = inlined_call_operand.hbm [shape: bf16[256,256], index: 5, kind: input, shape index: {}]   ;;  %s1296_s6 = inlined_call_operand.vmem [shape: f32[1,256], index: 6, kind: input, shape index: {}]   ;;  %s1297_s7 = inlined_call_operand.vmem [shape: f32[2,256], index: 7, kind: input, shape index: {}]   ;;  %s1298_s8 = inlined_call_operand.vmem [shape: f32[2], index: 8, kind: input, shape index: {}]   ;;  %s1299_s9 = inlined_call_operand.vmem [shape: f32[8,2], index: 9, kind: output, shape index: {}]  }
   0x1   :  { %15 = vsyncpa [#allocation6], 0  ;;  %s41_s11 = sshll.u32 %s1294_s4, 4  ;;  %s42_s11 = int_to_ptr.hbm [resolvable:$true] %s41_s11 }
   0x2   :  { %16 = vsyncpa [#allocation4], 0  ;;  %s1179_s12 = smov [#allocation5]   ;;  %s27_s16 = sshll.u32 %s1293_s3, 4  ;;  %s28_s16 = int_to_ptr.hbm [resolvable:$true] %s27_s16 }
   0x3   :  { %s43_s13 = sshll.u32 %s1179_s12, 4  ;;  %s1180_s17 = smov [#allocation2]   ;;  %s44_s13 = int_to_ptr.vmem [resolvable:$true] %s43_s13 }
   0x4   :  { %46 = dma.hbm_to_vmem [thread:$0]  %s42_s11, 32, %s44_s13, [#allocation6]  }
   0x5   :  { %s29_s18 = sshll.u32 %s1180_s17, 4  ;;  %s1181_s19 = smov 128   ;;  %s30_s18 = int_to_ptr.vmem [resolvable:$true] %s29_s18 }
   0x6   :  { %s1182_s20 = smov 8   ;;  %s51_s4 = sshll.u32 %s1295_s5, 4  ;;  %s52_s4 = int_to_ptr.hbm [resolvable:$true] %s51_s4 }
   0x7   :  { %35 = dma.hbm_to_vmem [thread:$0]  %s28_s16, 4096, %s30_s18, [#allocation3], %s1181_s19, %s1181_s19, %s1182_s20  }
   0x8   :  { %s1183_s23 = smov [#allocation7]   ;;  %s69_s3 = sshll.u32 %s1298_s8, 4  ;;  %s70_s3 = int_to_ptr.vmem [resolvable:$true] %s69_s3 }
   0x9   :  { %s53_s24 = sshll.u32 %s1183_s23, 4  ;;  %s1184_s27 = smov [#allocation8]   ;;  %s54_s24 = int_to_ptr.vmem [resolvable:$true] %s53_s24 }
   0xa   :  { %59 = dma.hbm_to_vmem [thread:$0]  %s52_s4, 4096, %s54_s24, [#allocation6], %s1181_s19, %s1181_s19, %s1182_s20  }
   0xb   :  { %72 = dma.vmem_to_smem %s70_s3, 16, %s1184_s27, [#allocation4]  }
   0xc   :  { %1173 = dma.done.wait [#allocation3], 4096  }
   0xd   :  { %1174 = vsyncadd [#allocation3], 4294963200 }
   0xe   :  { %1175 = dma.done.wait [#allocation6], 4128  }
   0xf   :  { %1176 = vsyncadd [#allocation6], 4294963168 }
  0x10   :  { %1177 = dma.done.wait [#allocation4], 16  }
  0x11   :  { %1178 = vsyncadd [#allocation4], 4294967280 }
  0x12   :  { %89 = sfence }
  0x13   :  { %v740_v0 = vld [vmem:[%s1291_s1] sm:$0xf]  ;;  %v1017_v1 = vld [vmem:[%s1291_s1 + $0xc] sm:$0xf0]  ;;  %v1015_v2 = vld [vmem:[%s1291_s1 + $0x4] sm:$0xf] }
  0x14   :  { %v741_v3 = vor.u32 %v1017_v1, %v740_v0  ;;  %v742_v4 = vld [vmem:[%s1291_s1 + $0x10] sm:$0xf0]  ;;  %v748_v5 = vld [vmem:[%s1291_s1 + $0x8] sm:$0xf]  ;;  %v1018_v6 = vld [vmem:[%s1291_s1 + $0x14] sm:$0xf0] }
  0x15   :  { %v745_v7 = vor.u32 %v1015_v2, %v742_v4  ;;  %v749_v8 = vor.u32 %v1018_v6, %v748_v5  ;;  %v91_v9 = vld [vmem:[%s1290_s0] sm:$0xff]  ;;  %vm127_vm0 = vcmask 130048   ;;  %v1016_v10 = vld [vmem:[%s1291_s1 + $0xc] sm:$0xf]  ;;  %v750_v11 = vld [vmem:[%s1291_s1 + $0x18] sm:$0xf0] }
  0x16   :  { %138 = vmatpush.bf16.msra.mxu0 %v741_v3  ;;  %v92_v12 = vpack.c.bf16 %v91_v9, %v91_v9  ;;  %v753_v13 = vor.u32 %v1016_v10, %v750_v11  ;;  %v816_v14 = vld [vmem:[#allocation2 + $0x70] sm:$0xf]  ;;  %v1034_v15 = vld [vmem:[#allocation2 + $0x74] sm:$0xf0]  ;;  %v1033_v19 = vld [vmem:[#allocation2 + $0x74] sm:$0xf] }
  0x17   :  { %v880_v16 = vld [vmem:[#allocation2 + $0xf0] sm:$0xf]  ;;  %151 = vmatpush.bf16.msra.mxu1 %v745_v7  ;;  %164 = vmatpush.bf16.msra.mxu2 %v749_v8  ;;  %v817_v17 = vor.u32 %v1034_v15, %v816_v14  ;;  %v1050_v18 = vld [vmem:[#allocation2 + $0xf4] sm:$0xf0]  ;;  %v818_v20 = vld [vmem:[#allocation2 + $0x78] sm:$0xf0] }
  0x18   :  { %177 = vmatpush.bf16.msra.mxu3 %v753_v13  ;;  %v881_v21 = vor.u32 %v1050_v18, %v880_v16  ;;  %v821_v22 = vor.u32 %v1033_v19, %v818_v20  ;;  %v1049_v23 = vld [vmem:[#allocation2 + $0xf4] sm:$0xf]  ;;  %v882_v24 = vld [vmem:[#allocation2 + $0xf8] sm:$0xf0]  ;;  %v808_v25 = vld [vmem:[#allocation2 + $0x60] sm:$0xf] }
  0x19   :  { %754 = vmatmul.msk.bf16.vlgmr.msra.gmra.mxu0 %vm127_vm0, %v92_v12  ;;  %v885_v26 = vor.u32 %v1049_v23, %v882_v24  ;;  %v1032_v27 = vld [vmem:[#allocation2 + $0x64] sm:$0xf0]  ;;  %v872_v28 = vld [vmem:[#allocation2 + $0xe0] sm:$0xf]  ;;  %v1031_v30 = vld [vmem:[#allocation2 + $0x64] sm:$0xf] }
  0x1a   :  { %v1048_v29 = vld [vmem:[#allocation2 + $0xe4] sm:$0xf0]  ;;  %755 = vmatmul.msk.bf16.vlgmr.msra.gmra.mxu1 %vm127_vm0, %v92_v12  ;;  %756 = vmatmul.msk.bf16.vlgmr.msra.gmra.mxu2 %vm127_vm0, %v92_v12  ;;  %v810_v31 = vld [vmem:[#allocation2 + $0x68] sm:$0xf0]  ;;  %v1047_v32 = vld [vmem:[#allocation2 + $0xe4] sm:$0xf]  ;;  %v809_v33 = vor.u32 %v1032_v27, %v808_v25 }
  0x1b   :  { %757 = vmatmul.msk.bf16.vlgmr.msra.gmra.mxu3 %vm127_vm0, %v92_v12  ;;  %389 = vmatpush.bf16.msrb.mxu0 %v817_v17  ;;  %v874_v34 = vld [vmem:[#allocation2 + $0xe8] sm:$0xf0]  ;;  %v873_v35 = vor.u32 %v1048_v29, %v872_v28  ;;  %v813_v36 = vor.u32 %v1031_v30, %v810_v31  ;;  %v800_v37 = vld [vmem:[#allocation2 + $0x50] sm:$0xf]  ;;  %v1030_v38 = vld [vmem:[#allocation2 + $0x54] sm:$0xf0] }
  0x1c   :  { %402 = vmatpush.bf16.msrb.mxu1 %v881_v21  ;;  %415 = vmatpush.bf16.msrb.mxu2 %v821_v22  ;;  %v864_v39 = vld [vmem:[#allocation2 + $0xd0] sm:$0xf]  ;;  %v877_v40 = vor.u32 %v1047_v32, %v874_v34  ;;  %v1046_v41 = vld [vmem:[#allocation2 + $0xd4] sm:$0xf0]  ;;  %v1029_v42 = vld [vmem:[#allocation2 + $0x54] sm:$0xf]  ;;  %v801_v46 = vor.u32 %v1030_v38, %v800_v37 }
  0x1d   :  { %428 = vmatpush.bf16.msrb.mxu3 %v885_v26  ;;  %v802_v43 = vld [vmem:[#allocation2 + $0x58] sm:$0xf0]  ;;  %v1045_v44 = vld [vmem:[#allocation2 + $0xd4] sm:$0xf]  ;;  %v865_v47 = vor.u32 %v1046_v41, %v864_v39  ;;  %v792_v49 = vld [vmem:[#allocation2 + $0x40] sm:$0xf] }
  0x1e   :  { %v866_v45 = vld [vmem:[#allocation2 + $0xd8] sm:$0xf0]  ;;  %v805_v48 = vor.u32 %v1029_v42, %v802_v43  ;;  %v1028_v50 = vld [vmem:[#allocation2 + $0x44] sm:$0xf0]  ;;  %v856_v51 = vld [vmem:[#allocation2 + $0xc0] sm:$0xf] }
  0x1f   :  { %390 = vmatpush.bf16.msrb.mxu0 %v809_v33  ;;  %v869_v52 = vor.u32 %v1045_v44, %v866_v45  ;;  %v1044_v53 = vld [vmem:[#allocation2 + $0xc4] sm:$0xf0]  ;;  %v1027_v54 = vld [vmem:[#allocation2 + $0x44] sm:$0xf]  ;;  %v794_v55 = vld [vmem:[#allocation2 + $0x48] sm:$0xf0]  ;;  %v793_v58 = vor.u32 %v1028_v50, %v792_v49 }
  0x20   :  { %403 = vmatpush.bf16.msrb.mxu1 %v873_v35  ;;  %416 = vmatpush.bf16.msrb.mxu2 %v813_v36  ;;  %v1043_v56 = vld [vmem:[#allocation2 + $0xc4] sm:$0xf]  ;;  %v858_v57 = vld [vmem:[#allocation2 + $0xc8] sm:$0xf0]  ;;  %v857_v59 = vor.u32 %v1044_v53, %v856_v51  ;;  %v797_v60 = vor.u32 %v1027_v54, %v794_v55  ;;  %v784_v61 = vld [vmem:[#allocation2 + $0x30] sm:$0xf] }
  0x21   :  { %429 = vmatpush.bf16.msrb.mxu3 %v877_v40  ;;  %v1026_v62 = vld [vmem:[#allocation2 + $0x34] sm:$0xf0]  ;;  %v848_v63 = vld [vmem:[#allocation2 + $0xb0] sm:$0xf]  ;;  %v861_v0 = vor.u32 %v1043_v56, %v858_v57  ;;  %v1025_v2 = vld [vmem:[#allocation2 + $0x34] sm:$0xf] }
  0x22   :  { %v1042_v1 = vld [vmem:[#allocation2 + $0xb4] sm:$0xf0]  ;;  %v786_v3 = vld [vmem:[#allocation2 + $0x38] sm:$0xf0]  ;;  %v1041_v4 = vld [vmem:[#allocation2 + $0xb4] sm:$0xf]  ;;  %v785_v6 = vor.u32 %v1026_v62, %v784_v61 }
  0x23   :  { %391 = vmatpush.bf16.msrb.mxu0 %v801_v46  ;;  %v850_v5 = vld [vmem:[#allocation2 + $0xb8] sm:$0xf0]  ;;  %v849_v7 = vor.u32 %v1042_v1, %v848_v63  ;;  %v789_v8 = vor.u32 %v1025_v2, %v786_v3  ;;  %v776_v9 = vld [vmem:[#allocation2 + $0x20] sm:$0xf]  ;;  %v1024_v10 = vld [vmem:[#allocation2 + $0x24] sm:$0xf0] }
  0x24   :  { %404 = vmatpush.bf16.msrb.mxu1 %v865_v47  ;;  %417 = vmatpush.bf16.msrb.mxu2 %v805_v48  ;;  %v840_v11 = vld [vmem:[#allocation2 + $0xa0] sm:$0xf]  ;;  %v853_v12 = vor.u32 %v1041_v4, %v850_v5  ;;  %v1040_v13 = vld [vmem:[#allocation2 + $0xa4] sm:$0xf0]  ;;  %v1023_v14 = vld [vmem:[#allocation2 + $0x24] sm:$0xf]  ;;  %v777_v18 = vor.u32 %v1024_v10, %v776_v9 }
  0x25   :  { %430 = vmatpush.bf16.msrb.mxu3 %v869_v52  ;;  %v778_v15 = vld [vmem:[#allocation2 + $0x28] sm:$0xf0]  ;;  %v1039_v16 = vld [vmem:[#allocation2 + $0xa4] sm:$0xf]  ;;  %v841_v19 = vor.u32 %v1040_v13, %v840_v11  ;;  %v768_v21 = vld [vmem:[#allocation2 + $0x10] sm:$0xf] }
  0x26   :  { %v842_v17 = vld [vmem:[#allocation2 + $0xa8] sm:$0xf0]  ;;  %v781_v20 = vor.u32 %v1023_v14, %v778_v15  ;;  %v1022_v22 = vld [vmem:[#allocation2 + $0x14] sm:$0xf0]  ;;  %v832_v23 = vld [vmem:[#allocation2 + $0x90] sm:$0xf] }
  0x27   :  { %392 = vmatpush.bf16.msrb.mxu0 %v793_v58  ;;  %v845_v24 = vor.u32 %v1039_v16, %v842_v17  ;;  %v1038_v25 = vld [vmem:[#allocation2 + $0x94] sm:$0xf0]  ;;  %v1021_v26 = vld [vmem:[#allocation2 + $0x14] sm:$0xf]  ;;  %v770_v27 = vld [vmem:[#allocation2 + $0x18] sm:$0xf0]  ;;  %v769_v30 = vor.u32 %v1022_v22, %v768_v21 }
  0x28   :  { %405 = vmatpush.bf16.msrb.mxu1 %v857_v59  ;;  %418 = vmatpush.bf16.msrb.mxu2 %v797_v60  ;;  %v1037_v28 = vld [vmem:[#allocation2 + $0x94] sm:$0xf]  ;;  %v834_v29 = vld [vmem:[#allocation2 + $0x98] sm:$0xf0]  ;;  %v760_v31 = vld [vmem:[#allocation2] sm:$0xf]  ;;  %v833_v33 = vor.u32 %v1038_v25, %v832_v23  ;;  %v773_v34 = vor.u32 %v1021_v26, %v770_v27 }
  0x29   :  { %431 = vmatpush.bf16.msrb.mxu3 %v861_v0  ;;  %v1020_v32 = vld [vmem:[#allocation2 + $0x4] sm:$0xf0]  ;;  %v824_v35 = vld [vmem:[#allocation2 + $0x80] sm:$0xf]  ;;  %v1019_v37 = vld [vmem:[#allocation2 + $0x4] sm:$0xf]  ;;  %v837_v38 = vor.u32 %v1037_v28, %v834_v29 }
  0x2a   :  { %v1036_v36 = vld [vmem:[#allocation2 + $0x84] sm:$0xf0]  ;;  %v762_v39 = vld [vmem:[#allocation2 + $0x8] sm:$0xf0]  ;;  %v1035_v40 = vld [vmem:[#allocation2 + $0x84] sm:$0xf]  ;;  %v761_v45 = vor.u32 %v1020_v32, %v760_v31 }
  0x2b   :  { %393 = vmatpush.bf16.msrb.mxu0 %v785_v6  ;;  %v826_v41 = vld [vmem:[#allocation2 + $0x88] sm:$0xf0]  ;;  %v944_v42 = vld [vmem:[#allocation7 + $0x70] sm:$0xf]  ;;  %v1066_v43 = vld [vmem:[#allocation7 + $0x74] sm:$0xf0]  ;;  %v825_v49 = vor.u32 %v1036_v36, %v824_v35  ;;  %v765_v50 = vor.u32 %v1019_v37, %v762_v39 }
  0x2c   :  { %406 = vmatpush.bf16.msrb.mxu1 %v849_v7  ;;  %419 = vmatpush.bf16.msrb.mxu2 %v789_v8  ;;  %v1008_v44 = vld [vmem:[#allocation7 + $0xf0] sm:$0xf]  ;;  %v1082_v46 = vld [vmem:[#allocation7 + $0xf4] sm:$0xf0]  ;;  %v1065_v47 = vld [vmem:[#allocation7 + $0x74] sm:$0xf]  ;;  %v829_v53 = vor.u32 %v1035_v40, %v826_v41  ;;  %v945_v54 = vor.u32 %v1066_v43, %v944_v42 }
  0x2d   :  { %432 = vmatpush.bf16.msrb.mxu3 %v853_v12  ;;  %v946_v48 = vld [vmem:[#allocation7 + $0x78] sm:$0xf0]  ;;  %v1081_v51 = vld [vmem:[#allocation7 + $0xf4] sm:$0xf]  ;;  %v1009_v55 = vor.u32 %v1082_v46, %v1008_v44  ;;  %v936_v57 = vld [vmem:[#allocation7 + $0x60] sm:$0xf] }
  0x2e   :  { %v1010_v52 = vld [vmem:[#allocation7 + $0xf8] sm:$0xf0]  ;;  %v949_v56 = vor.u32 %v1065_v47, %v946_v48  ;;  %v1064_v58 = vld [vmem:[#allocation7 + $0x64] sm:$0xf0]  ;;  %v1000_v59 = vld [vmem:[#allocation7 + $0xe0] sm:$0xf] }
  0x2f   :  { %394 = vmatpush.bf16.msrb.mxu0 %v777_v18  ;;  %v1013_v60 = vor.u32 %v1081_v51, %v1010_v52  ;;  %v1080_v61 = vld [vmem:[#allocation7 + $0xe4] sm:$0xf0]  ;;  %v1063_v62 = vld [vmem:[#allocation7 + $0x64] sm:$0xf]  ;;  %v938_v63 = vld [vmem:[#allocation7 + $0x68] sm:$0xf0]  ;;  %v937_v2 = vor.u32 %v1064_v58, %v936_v57 }
  0x30   :  { %407 = vmatpush.bf16.msrb.mxu1 %v841_v19  ;;  %420 = vmatpush.bf16.msrb.mxu2 %v781_v20  ;;  %v1079_v0 = vld [vmem:[#allocation7 + $0xe4] sm:$0xf]  ;;  %v1002_v1 = vld [vmem:[#allocation7 + $0xe8] sm:$0xf0]  ;;  %v1001_v3 = vor.u32 %v1080_v61, %v1000_v59  ;;  %v941_v4 = vor.u32 %v1063_v62, %v938_v63  ;;  %v928_v6 = vld [vmem:[#allocation7 + $0x50] sm:$0xf] }
  0x31   :  { %433 = vmatpush.bf16.msrb.mxu3 %v845_v24  ;;  %v1005_v5 = vor.u32 %v1079_v0, %v1002_v1  ;;  %v1062_v7 = vld [vmem:[#allocation7 + $0x54] sm:$0xf0]  ;;  %v992_v8 = vld [vmem:[#allocation7 + $0xd0] sm:$0xf]  ;;  %v1061_v11 = vld [vmem:[#allocation7 + $0x54] sm:$0xf] }
  0x32   :  { %v929_v9 = vor.u32 %v1062_v7, %v928_v6  ;;  %v1078_v10 = vld [vmem:[#allocation7 + $0xd4] sm:$0xf0]  ;;  %v930_v12 = vld [vmem:[#allocation7 + $0x58] sm:$0xf0]  ;;  %v1077_v15 = vld [vmem:[#allocation7 + $0xd4] sm:$0xf] }
  0x33   :  { %395 = vmatpush.bf16.msrb.mxu0 %v769_v30  ;;  %v993_v13 = vor.u32 %v1078_v10, %v992_v8  ;;  %v933_v14 = vor.u32 %v1061_v11, %v930_v12  ;;  %v994_v16 = vld [vmem:[#allocation7 + $0xd8] sm:$0xf0]  ;;  %v920_v18 = vld [vmem:[#allocation7 + $0x40] sm:$0xf]  ;;  %v1060_v19 = vld [vmem:[#allocation7 + $0x44] sm:$0xf0] }
  0x34   :  { %408 = vmatpush.bf16.msrb.mxu1 %v833_v33  ;;  %421 = vmatpush.bf16.msrb.mxu2 %v773_v34  ;;  %v997_v17 = vor.u32 %v1077_v15, %v994_v16  ;;  %v984_v20 = vld [vmem:[#allocation7 + $0xc0] sm:$0xf]  ;;  %v921_v21 = vor.u32 %v1060_v19, %v920_v18  ;;  %v1076_v22 = vld [vmem:[#allocation7 + $0xc4] sm:$0xf0]  ;;  %v1059_v23 = vld [vmem:[#allocation7 + $0x44] sm:$0xf] }
  0x35   :  { %434 = vmatpush.bf16.msrb.mxu3 %v837_v38  ;;  %v922_v24 = vld [vmem:[#allocation7 + $0x48] sm:$0xf0]  ;;  %v985_v25 = vor.u32 %v1076_v22, %v984_v20  ;;  %v1075_v27 = vld [vmem:[#allocation7 + $0xc4] sm:$0xf]  ;;  %v912_v30 = vld [vmem:[#allocation7 + $0x30] sm:$0xf] }
  0x36   :  { %v925_v26 = vor.u32 %v1059_v23, %v922_v24  ;;  %v986_v28 = vld [vmem:[#allocation7 + $0xc8] sm:$0xf0]  ;;  %v1058_v31 = vld [vmem:[#allocation7 + $0x34] sm:$0xf0]  ;;  %v976_v32 = vld [vmem:[#allocation7 + $0xb0] sm:$0xf] }
  0x37   :  { %396 = vmatpush.bf16.msrb.mxu0 %v761_v45  ;;  %v989_v29 = vor.u32 %v1075_v27, %v986_v28  ;;  %v913_v33 = vor.u32 %v1058_v31, %v912_v30  ;;  %v1074_v34 = vld [vmem:[#allocation7 + $0xb4] sm:$0xf0]  ;;  %v1057_v35 = vld [vmem:[#allocation7 + $0x34] sm:$0xf]  ;;  %v914_v36 = vld [vmem:[#allocation7 + $0x38] sm:$0xf0] }
  0x38   :  { %409 = vmatpush.bf16.msrb.mxu1 %v825_v49  ;;  %422 = vmatpush.bf16.msrb.mxu2 %v765_v50  ;;  %v977_v37 = vor.u32 %v1074_v34, %v976_v32  ;;  %v917_v38 = vor.u32 %v1057_v35, %v914_v36  ;;  %v1073_v39 = vld [vmem:[#allocation7 + $0xb4] sm:$0xf]  ;;  %v978_v40 = vld [vmem:[#allocation7 + $0xb8] sm:$0xf0]  ;;  %v904_v42 = vld [vmem:[#allocation7 + $0x20] sm:$0xf] }
  0x39   :  { %435 = vmatpush.bf16.msrb.mxu3 %v829_v53  ;;  %v981_v41 = vor.u32 %v1073_v39, %v978_v40  ;;  %v1056_v43 = vld [vmem:[#allocation7 + $0x24] sm:$0xf0]  ;;  %v968_v44 = vld [vmem:[#allocation7 + $0xa0] sm:$0xf]  ;;  %v1055_v47 = vld [vmem:[#allocation7 + $0x24] sm:$0xf] }
  0x3a   :  { %v905_v45 = vor.u32 %v1056_v43, %v904_v42  ;;  %v1072_v46 = vld [vmem:[#allocation7 + $0xa4] sm:$0xf0]  ;;  %v906_v48 = vld [vmem:[#allocation7 + $0x28] sm:$0xf0]  ;;  %v1071_v51 = vld [vmem:[#allocation7 + $0xa4] sm:$0xf] }
  0x3b   :  { %641 = vmatpush.bf16.msra.mxu0 %v945_v54  ;;  %v969_v49 = vor.u32 %v1072_v46, %v968_v44  ;;  %v909_v50 = vor.u32 %v1055_v47, %v906_v48  ;;  %v970_v52 = vld [vmem:[#allocation7 + $0xa8] sm:$0xf0]  ;;  %v896_v54 = vld [vmem:[#allocation7 + $0x10] sm:$0xf]  ;;  %v1070_v58 = vld [vmem:[#allocation7 + $0x94] sm:$0xf0] }
  0x3c   :  { %654 = vmatpush.bf16.msra.mxu1 %v1009_v55  ;;  %667 = vmatpush.bf16.msra.mxu2 %v949_v56  ;;  %v973_v53 = vor.u32 %v1071_v51, %v970_v52  ;;  %v1054_v55 = vld [vmem:[#allocation7 + $0x14] sm:$0xf0]  ;;  %v960_v56 = vld [vmem:[#allocation7 + $0x90] sm:$0xf]  ;;  %v1053_v59 = vld [vmem:[#allocation7 + $0x14] sm:$0xf] }
  0x3d   :  { %680 = vmatpush.bf16.msra.mxu3 %v1013_v60  ;;  %v897_v57 = vor.u32 %v1054_v55, %v896_v54  ;;  %v898_v60 = vld [vmem:[#allocation7 + $0x18] sm:$0xf0]  ;;  %v961_v61 = vor.u32 %v1070_v58, %v960_v56  ;;  %v1069_v63 = vld [vmem:[#allocation7 + $0x94] sm:$0xf]  ;;  %v888_v1 = vld [vmem:[#allocation7] sm:$0xf] }
  0x3e   :  { %v901_v62 = vor.u32 %v1053_v59, %v898_v60  ;;  %v962_v0 = vld [vmem:[#allocation7 + $0x98] sm:$0xf0]  ;;  %v1051_v8 = vld [vmem:[#allocation7 + $0x4] sm:$0xf]  ;;  %v954_v12 = vld [vmem:[#allocation7 + $0x88] sm:$0xf0] }
  0x3f   :  { %642 = vmatpush.bf16.msra.mxu0 %v937_v2  ;;  %v965_v2 = vor.u32 %v1069_v63, %v962_v0  ;;  %v1067_v10 = vld [vmem:[#allocation7 + $0x84] sm:$0xf]  ;;  %v223_v39 = vld [vmem:[#allocation5] sm:$0x3]  ;;  %vm729_vm2 = vcmask 15360  }
  0x40   :  { %655 = vmatpush.bf16.msra.mxu1 %v1001_v3  ;;  %668 = vmatpush.bf16.msra.mxu2 %v941_v4  ;;  %v1052_v3 = vld [vmem:[#allocation7 + $0x4] sm:$0xf0]  ;;  %v952_v4 = vld [vmem:[#allocation7 + $0x80] sm:$0xf]  ;;  %v225_v40 = vperm.slane %v223_v39, 0 }
  0x41   :  { %681 = vmatpush.bf16.msra.mxu3 %v1005_v5  ;;  %v1068_v5 = vld [vmem:[#allocation7 + $0x84] sm:$0xf0]  ;;  %v889_v6 = vor.u32 %v1052_v3, %v888_v1  ;;  %v695_v44 = vld [vmem:[%s1297_s7] sm:$0xf]  ;;  %s1014_s7 = sld [smem:[#allocation8 + $0x1]] }
  0x42   :  { %v953_v7 = vor.u32 %v1068_v5, %v952_v4  ;;  %v697_v47 = vperm.slane %v695_v44, 0  ;;  %v698_v48 = vperm.slane %v695_v44, 2  ;;  %v475_v58 = vld [vmem:[%s1296_s6] sm:$0x3]  ;;  %s708_s6 = sld [smem:[#allocation8]] }
  0x43   :  { %643 = vmatpush.bf16.msra.mxu0 %v929_v9  ;;  %v890_v9 = vld [vmem:[#allocation7 + $0x8] sm:$0xf0]  ;;  %v477_v60 = vperm.slane %v475_v58, 0  ;;  %v478_v5 = vperm.slane %v475_v58, 1 }
  0x44   :  { %656 = vmatpush.bf16.msra.mxu1 %v993_v13  ;;  %669 = vmatpush.bf16.msra.mxu2 %v933_v14  ;;  %v893_v11 = vor.u32 %v1051_v8, %v890_v9  ;;  %v957_v13 = vor.u32 %v1067_v10, %v954_v12  ;;  %v97_v14 = vld [vmem:[%s1292_s2] sm:$0xf]  ;;  %v701_v56 = vperm.slane %v697_v47, 0  ;;  %v712_v8 = vperm.slane %v695_v44, 3 }
  0x45   :  { %682 = vmatpush.bf16.msra.mxu3 %v997_v17  ;;  %v99_v15 = vperm.slane %v97_v14, 0  ;;  %v100_v16 = vperm.slane %v97_v14, 1  ;;  %v102_v28 = vperm.slane %v97_v14, 3 }
  0x47   :  { %644 = vmatpush.bf16.msra.mxu0 %v921_v21 }
  0x48   :  { %657 = vmatpush.bf16.msra.mxu1 %v985_v25  ;;  %670 = vmatpush.bf16.msra.mxu2 %v925_v26  ;;  %v101_v25 = vperm.slane %v97_v14, 2 }
  0x49   :  { %683 = vmatpush.bf16.msra.mxu3 %v989_v29 }
  0x4b   :  { %645 = vmatpush.bf16.msra.mxu0 %v913_v33 }
  0x4c   :  { %658 = vmatpush.bf16.msra.mxu1 %v977_v37  ;;  %671 = vmatpush.bf16.msra.mxu2 %v917_v38 }
  0x4d   :  { %684 = vmatpush.bf16.msra.mxu3 %v981_v41 }
  0x4f   :  { %646 = vmatpush.bf16.msra.mxu0 %v905_v45  ;;  %v226_v45 = vperm.slane %v223_v39, 1 }
  0x50   :  { %659 = vmatpush.bf16.msra.mxu1 %v969_v49  ;;  %672 = vmatpush.bf16.msra.mxu2 %v909_v50 }
  0x51   :  { %685 = vmatpush.bf16.msra.mxu3 %v973_v53 }
  0x53   :  { %647 = vmatpush.bf16.msra.mxu0 %v897_v57  ;;  %v702_v57 = vperm.slane %v698_v48, 0 }
  0x54   :  { %660 = vmatpush.bf16.msra.mxu1 %v961_v61  ;;  %673 = vmatpush.bf16.msra.mxu2 %v901_v62 }
  0x55   :  { %686 = vmatpush.bf16.msra.mxu3 %v965_v2 }
  0x57   :  { %648 = vmatpush.bf16.msra.mxu0 %v889_v6 }
  0x58   :  { %661 = vmatpush.bf16.msra.mxu1 %v953_v7  ;;  %674 = vmatpush.bf16.msra.mxu2 %v893_v11  ;;  %v711_v7 = vperm.slane %v695_v44, 1 }
  0x59   :  { %687 = vmatpush.bf16.msra.mxu3 %v957_v13 }
  0x5a   :  { %v715_v14 = vperm.slane %v711_v7, 1 }
  0x96   :  { %v140_v17 = vpop.f32.mrf.mxu0 }
  0x97   :  { %v141_v18 = vadd.f32 %v140_v17, %v99_v15  ;;  %v153_v19 = vpop.f32.mrf.mxu1 }
  0x98   :  { %v154_v20 = vadd.f32 %v153_v19, %v100_v16  ;;  %v716_v16 = vperm.slane %v712_v8, 1 }
  0x99   :  { %v183_v21 = vmax.f32 %v141_v18, 0.0 }
  0x9a   :  { %v184_v22 = vmax.f32 %v154_v20, 0.0 }
  0x9b   :  { %v187_v23 = vpack.c.bf16 %v183_v21, %v183_v21 }
  0x9c   :  { %v188_v24 = vpack.c.bf16 %v184_v22, %v184_v22 }
  0x9d   :  { %397 = vmatmul.bf16.vlgmr.msrb.gmra.mxu0 %v187_v23  ;;  %423 = vmatmul.bf16.vlgmr.msrb.gmra.mxu2 %v187_v23  ;;  %v166_v26 = vpop.f32.mrf.mxu2 }
  0x9e   :  { %410 = vmatmul.bf16.vlgmr.msrb.gmra.mxu1 %v188_v24  ;;  %436 = vmatmul.bf16.vlgmr.msrb.gmra.mxu3 %v188_v24  ;;  %v142_v27 = vpop.f32.mrf.mxu0  ;;  %v179_v29 = vpop.f32.mrf.mxu3  ;;  %v167_v31 = vadd.f32 %v166_v26, %v101_v25  ;;  %v725_v25 = vlaneseq }
  0x9f   :  { %v155_v30 = vpop.f32.mrf.mxu1  ;;  %v180_v32 = vadd.f32 %v179_v29, %v102_v28  ;;  %v709_v27 = vstv %s708_s6  ;;  %v723_v28 = vstv %s1014_s7 }
  0xa0   :  { %v185_v33 = vmax.f32 %v167_v31, 0.0  ;;  %v726_v26 = vand.u32 127, %v725_v25 }
  0xa1   :  { %v186_v35 = vmax.f32 %v180_v32, 0.0 }
  0xa2   :  { %v189_v37 = vpack.c.bf16 %v185_v33, %v185_v33  ;;  %vm727_vm1 = vcmp.eq.s32.totalorder %v726_v26, 0 }
  0xa3   :  { %v190_v38 = vpack.c.bf16 %v186_v35, %v186_v35 }
  0xa5   :  { %v168_v34 = vpop.f32.mrf.mxu2 }
  0xa6   :  { %v181_v36 = vpop.f32.mrf.mxu3 }
  0xad   :  { %649 = vmatmul.bf16.vlgmr.msra.gmra.mxu0 %v189_v37  ;;  %675 = vmatmul.bf16.vlgmr.msra.gmra.mxu2 %v189_v37 }
  0xae   :  { %662 = vmatmul.bf16.vlgmr.msra.gmra.mxu1 %v190_v38  ;;  %688 = vmatmul.bf16.vlgmr.msra.gmra.mxu3 %v190_v38 }
 0x11a   :  { %v398_v41 = vpop.f32.mrf.mxu0 }
 0x11b   :  { %v399_v42 = vadd.f32 %v398_v41, %v225_v40  ;;  %v411_v43 = vpop.f32.mrf.mxu1 }
 0x11d   :  { %v412_v46 = vadd.f32 %v411_v43, %v399_v42 }
 0x11f   :  { %v441_v53 = vmax.f32 %v412_v46, 0.0 }
 0x120   :  { %v424_v49 = vpop.f32.mrf.mxu2 }
 0x121   :  { %v425_v50 = vadd.f32 %v424_v49, %v226_v45  ;;  %v437_v51 = vpop.f32.mrf.mxu3  ;;  %v703_v61 = vmul.f32 %v701_v56, %v441_v53 }
 0x122   :  { %v400_v52 = vpop.f32.mrf.mxu0 }
 0x123   :  { %v438_v54 = vadd.f32 %v437_v51, %v425_v50  ;;  %v413_v55 = vpop.f32.mrf.mxu1 }
 0x125   :  { %v442_v59 = vmax.f32 %v438_v54, 0.0 }
 0x127   :  { %v704_v62 = vmul.f32 %v702_v57, %v442_v59 }
 0x128   :  { %v426_v63 = vpop.f32.mrf.mxu2 }
 0x129   :  { %v439_v0 = vpop.f32.mrf.mxu3  ;;  %v705_v1 = vadd.f32 %v704_v62, %v703_v61 }
 0x12a   :  { %v650_v2 = vpop.f32.mrf.mxu0 }
 0x12b   :  { %v651_v3 = vadd.f32 %v650_v2, %v477_v60  ;;  %v663_v4 = vpop.f32.mrf.mxu1  ;;  %706 = vadd.xlane.f32.xlu0 %v705_v1 }
 0x12d   :  { %v664_v6 = vadd.f32 %v663_v4, %v651_v3 }
 0x12f   :  { %v693_v13 = vmax.f32 %v664_v6, 0.0 }
 0x130   :  { %v676_v9 = vpop.f32.mrf.mxu2 }
 0x131   :  { %v677_v10 = vadd.f32 %v676_v9, %v478_v5  ;;  %v689_v11 = vpop.f32.mrf.mxu3  ;;  %v717_v19 = vmul.f32 %v715_v14, %v693_v13 }
 0x132   :  { %v652_v12 = vpop.f32.mrf.mxu0 }
 0x133   :  { %v690_v15 = vadd.f32 %v689_v11, %v677_v10  ;;  %v665_v17 = vpop.f32.mrf.mxu1 }
 0x135   :  { %v694_v18 = vmax.f32 %v690_v15, 0.0 }
 0x137   :  { %v718_v20 = vmul.f32 %v716_v16, %v694_v18 }
 0x138   :  { %v678_v21 = vpop.f32.mrf.mxu2 }
 0x139   :  { %v691_v22 = vpop.f32.mrf.mxu3  ;;  %v719_v23 = vadd.f32 %v718_v20, %v717_v19 }
 0x13b   :  { %720 = vadd.xlane.f32.xlu0 %v719_v23 }
 0x19e   :  { %v707_v24 = vpop.xlane.xlu0 %706 }
 0x19f   :  { %v710_v30 = vadd.f32 %v709_v27, %v707_v24 }
 0x1ae   :  { %v721_v29 = vpop.xlane.xlu0 %720 }
 0x1af   :  { %v724_v31 = vadd.f32 %v723_v28, %v721_v29 }
 0x1b1   :  { %v728_v32 = vsel %vm727_vm1, %v710_v30, %v724_v31 }
 0x1b2   :  { %730 = vst.msk [vmem:[%s1299_s9] sm:$0xff] %vm729_vm2, %v728_v32 }
 0x1b3   :  { %735 = vsyncpa [#allocation3], 1 }
 0x1b4   :  { %736 = vsyncpa [#allocation6], 1 }
 0x1b5   :  { %737 = vsyncpa [#allocation4], 1 }

</bundles_post_ra>
